<compile_context>
chip_gen: v6e
topology: v6e:2x2x1
jax: 0.10.0
libtpu: 0.0.40
codegen_flags: <defaults>
</compile_context>

<pallas_src>
import functools
import math

import jax
import jax.numpy as jnp
from jax.experimental import pallas as pl
from jax.experimental.pallas import tpu as pltpu

NEG_INF = -1e30     # exp(NEG_INF - finite_rowmax) underflows to exactly 0.0 in f32


@functools.lru_cache(maxsize=None)
def _vmem_limit_bytes():
    """Generation-aware scoped-VMEM budget: ~5/8 of physical VMEM, capped at 96 MiB."""
    try:
        cap = int(pltpu.get_tpu_info().vmem_capacity_bytes)
    except Exception:                      # query unavailable -> conservative (v7x) default
        cap = 64 * 1024 * 1024
    return min(cap * 5 // 8, 96 * 1024 * 1024)   # ~40 MiB on v7x, 80 MiB on v5e/v6e


def _cparams(semantics):
    return pltpu.CompilerParams(dimension_semantics=semantics,
                                vmem_limit_bytes=_vmem_limit_bytes())


def _round_up(x, m):
    return (x + m - 1) // m * m


# --------------------------------------------------------------------------
# Pallas kernels
# --------------------------------------------------------------------------
def _proj_kernel(x_ref, w_ref, b_ref, y_ref):
    """One fused, lane-dense projection per dst-row tile:
    y = x @ [wq/sqrt(dh) | wk | wv | ws] + b   (single MXU weight push)."""
    xb = x_ref[...].astype(jnp.bfloat16)
    y = jnp.dot(xb, w_ref[...], preferred_element_type=jnp.float32) + b_ref[...]
    y_ref[...] = y.astype(jnp.bfloat16)


def _attn_kernel(q_ref, kT_ref, v_ref, skip_ref, bias_ref, wo_ref, bo_ref, o_ref):
    """Grouped masked attention + aggregation + grouped output proj + skip + ReLU
    for one dst-row tile.  1/sqrt(dh) is pre-folded into wq; K is resident in the
    lane-dense transposed (G, dh, S) layout; V stays at width dh (wo NOT folded)."""
    s = jnp.einsum('gnd,gdm->gnm', q_ref[...], kT_ref[...],
                   preferred_element_type=jnp.float32)          # (G, T, S) f32
    s = s + bias_ref[...].astype(jnp.float32)[None]             # edge bias / 0 / -1e30

    m = jnp.max(s, axis=-1, keepdims=True)
    p = jnp.exp(s - m)            # masked entries: exp(-1e30 - finite) == 0.0 exactly
    denom = jnp.sum(p, axis=-1, keepdims=True)
    attn = (p * pl.reciprocal(denom, approx=True)).astype(jnp.bfloat16)

    # Per-group aggregation at width dh, then the grouped output projection; the
    # group reduction collapses a small (G, T, c_out) f32 array on the VPU.
    msg = jnp.einsum('gnm,gmd->gnd', attn, v_ref[...],
                     preferred_element_type=jnp.float32)        # (G, T, dh)
    outg = jnp.einsum('gnd,gdc->gnc', msg.astype(jnp.bfloat16), wo_ref[...],
                      preferred_element_type=jnp.float32)       # (G, T, c_out)
    out = jnp.sum(outg, axis=0) + skip_ref[...].astype(jnp.float32) + bo_ref[...]
    o_ref[...] = jnp.maximum(out, 0.0).astype(o_ref.dtype)
    # TODO(synk): dropout(p=0.1) is identity in eval mode and is omitted here.


def _seq_gather_kernel(tbl_ref, lig_ref, out_ref):
    """res[slot] = ligand_x[tbl[0, slot]]; zero row where tbl[1, slot] == 0.
    The row itself is fetched by the data-dependent BlockSpec (scalar prefetch)."""
    i = pl.program_id(0)
    valid = (tbl_ref[1, i] > 0).astype(jnp.float32)
    out_ref[...] = lig_ref[...] * valid


# --------------------------------------------------------------------------
# Kernel wrappers
# --------------------------------------------------------------------------
def pght_conv(x, attn_bias, lw, *, groups, tile_n):
    """One PGHTConv layer (dense grouped graph attention) over padded node rows."""
    n_pad, c_in = x.shape
    four_c = lw["w_all"].shape[1]
    c_out = four_c // 4
    dh = c_out // groups
    assert n_pad % tile_n == 0 and tile_n % 8 == 0 and c_out % groups == 0
    grid = (n_pad // tile_n,)

    # ---- fused projections: one matmul, one lane-dense output per row tile ----
    y = pl.pallas_call(
        _proj_kernel,
        out_shape=jax.ShapeDtypeStruct((n_pad, four_c), jnp.bfloat16),
        grid=grid,
        in_specs=[pl.BlockSpec((tile_n, c_in), lambda i: (i, 0)),
                  pl.BlockSpec(lw["w_all"].shape, lambda i: (0, 0)),
                  pl.BlockSpec(lw["b_all"].shape, lambda i: (0, 0))],
        out_specs=pl.BlockSpec((tile_n, four_c), lambda i: (i, 0)),
        compiler_params=_cparams(("parallel",)),
    )(x, lw["w_all"], lw["b_all"])

    q2 = y[:, :c_out]
    k2 = y[:, c_out:2 * c_out]
    v2 = y[:, 2 * c_out:3 * c_out]
    skip2 = y[:, 3 * c_out:]

    # Group-major views for the attention kernel.  K (and only K) is additionally
    # transposed so its minor dim is the lane-dense src axis (n_pad), not dh=8.
    # This is layout plumbing on small [N, C]-sized arrays, done by XLA outside.
    qg = jnp.transpose(q2.reshape(n_pad, groups, dh), (1, 0, 2))   # (G, N, dh)
    kT = jnp.transpose(k2.reshape(n_pad, groups, dh), (1, 2, 0))   # (G, dh, N) lane-dense
    vg = jnp.transpose(v2.reshape(n_pad, groups, dh), (1, 0, 2))   # (G, N, dh)

    # ---- attention: tiled over dst rows; K / V / wo stay VMEM-resident ----
    # TODO(synk): for very large graphs, additionally tile the src (n_pad) axis
    # flash-style instead of keeping K / V fully resident (v7x 64 MiB VMEM).
    # TODO(synk): grid-invariant blocks (weights, K, V, wo, bo) could be
    # single-buffered via BlockSpec(pipeline_mode=pl.Buffered(1)) to halve their
    # VMEM footprint once large graph sizes make that necessary.
    return pl.pallas_call(
        _attn_kernel,
        out_shape=jax.ShapeDtypeStruct((n_pad, c_out), jnp.bfloat16),
        grid=grid,
        in_specs=[pl.BlockSpec((groups, tile_n, dh), lambda i: (0, i, 0)),   # q tile
                  pl.BlockSpec((groups, dh, n_pad), lambda i: (0, 0, 0)),    # K^T resident
                  pl.BlockSpec((groups, n_pad, dh), lambda i: (0, 0, 0)),    # V resident
                  pl.BlockSpec((tile_n, c_out), lambda i: (i, 0)),           # skip tile
                  pl.BlockSpec((tile_n, n_pad), lambda i: (i, 0)),           # bias tile
                  pl.BlockSpec((groups, dh, c_out), lambda i: (0, 0, 0)),    # wo (grouped)
                  pl.BlockSpec((1, c_out), lambda i: (0, 0))],               # bo
        out_specs=pl.BlockSpec((tile_n, c_out), lambda i: (i, 0)),
        compiler_params=_cparams(("parallel",)),
    )(qg, kT, vg, skip2, attn_bias, lw["wo_g"], lw["bo"])


def scatter_to_sequence(lig_x, batch_idx, pos_idx, batch_size, max_length):
    """res = zeros(batch, max_length, emb); res[(batch_idx, pos_idx)] = lig_x."""
    n_lig, c = lig_x.shape
    total = batch_size * max_length

    # Inverse map: output slot -> ligand row (-1 = empty slot).  Out-of-range
    # positions are dropped instead of corrupting neighbouring rows.
    flat = batch_idx * max_length + pos_idx
    flat = jnp.where((pos_idx >= 0) & (pos_idx < max_length), flat, total)
    inv = jnp.full((total,), -1, jnp.int32).at[flat].set(
        jnp.arange(n_lig, dtype=jnp.int32), mode="drop")
    # tbl[0] = clamped source row, tbl[1] = validity flag (scalar-prefetched to SMEM).
    tbl = jnp.stack([jnp.maximum(inv, 0), (inv >= 0).astype(jnp.int32)], axis=0)

    lig3 = lig_x.astype(jnp.float32).reshape(n_lig, 1, c)
    out = pl.pallas_call(
        _seq_gather_kernel,
        out_shape=jax.ShapeDtypeStruct((total, 1, c), jnp.float32),
        grid_spec=pltpu.PrefetchScalarGridSpec(
            num_scalar_prefetch=1,
            grid=(total,),
            in_specs=[pl.BlockSpec((1, 1, c), lambda i, tbl: (tbl[0, i], 0, 0))],
            out_specs=pl.BlockSpec((1, 1, c), lambda i, tbl: (i, 0, 0)),
        ),
        compiler_params=_cparams(("arbitrary",)),
    )(tbl, lig3)
    return out.reshape(batch_size, max_length, c)


# --------------------------------------------------------------------------
# JAX glue (graph bookkeeping, weight folding)
# --------------------------------------------------------------------------
def graph_batch_indices_to_sequence(batch_indices, batch_size):
    # Matches GraphEncoder._graph_batch_indices_to_sequence for sorted,
    # contiguous batch indices: position of each node within its batch segment.
    batch_indices = batch_indices.astype(jnp.int32)
    seg_start = jnp.searchsorted(batch_indices,
                                 jnp.arange(batch_size, dtype=jnp.int32))
    positions = (jnp.arange(batch_indices.shape[0], dtype=jnp.int32)
                 - seg_start[batch_indices].astype(jnp.int32))
    return batch_indices, positions


def _prepare_layer(p, groups, embed_w=None, embed_b=None):
    """Fuse [wq|wk|wv|ws] into one weight, fold 1/sqrt(dh) into wq and (optionally)
    a linear graph_embedder into the fused projection; keep wo grouped (unfolded)."""
    c_in, c_out = p["wq"].shape
    dh = c_out // groups
    scale = 1.0 / math.sqrt(dh)
    w_all = jnp.concatenate([p["wq"] * scale, p["wk"], p["wv"], p["ws"]], axis=1)
    if embed_w is not None:
        b_all = embed_b @ w_all                       # (1, 4*c_out)
        w_all = embed_w @ w_all                       # (f_raw, 4*c_out)
    else:
        b_all = jnp.zeros((1, 4 * c_out), jnp.float32)
    wo_g = p["wo"].reshape(groups, dh, c_out)         # grouped output projection
    return dict(w_all=w_all.astype(jnp.bfloat16), b_all=b_all,
                wo_g=wo_g.astype(jnp.bfloat16), bo=p["bo"])


def graph_encoder_forward(x_raw, edge_index, edge_attr, lig_batch, params, *,
                          n_lig, groups, max_length, batch_size, tile_n=256):
    n = x_raw.shape[0]
    # 128-aligned and an even number of dst-row tiles (>= 2) so the "parallel"
    # grid axis shards cleanly across both v7x TensorCores.
    pad_to = _round_up(max(128, 2 * tile_n), tile_n)
    n_pad = _round_up(n, pad_to)

    # ToUndirected(): append reversed edges, duplicate edge attributes.
    ei = jnp.concatenate([edge_index, edge_index[::-1]], axis=1)
    ea = jnp.concatenate([edge_attr, edge_attr], axis=0)
    src, dst = ei[0], ei[1]

    # Fused additive attention bias [dst, src], stored once in bf16:
    # edge-attr bias on edges, 0 on the diagonal (self loops keep every softmax
    # row non-empty, padded rows included), NEG_INF elsewhere (the mask).
    adj = jnp.zeros((n_pad, n_pad), jnp.float32).at[dst, src].max(1.0)
    adj = jnp.maximum(adj, jnp.eye(n_pad, dtype=jnp.float32))
    eb_vals = (ea @ params["w_edge"])[:, 0]
    eb = jnp.zeros((n_pad, n_pad), jnp.float32).at[dst, src].add(eb_vals)
    attn_bias = jnp.where(adj > 0, eb, NEG_INF).astype(jnp.bfloat16)

    x = jnp.pad(x_raw, ((0, n_pad - n), (0, 0)))

    # Conv stack; the (linear) graph_embedder is folded into layer 0's projections.
    for li, p in enumerate(params["convs"]):
        lw = _prepare_layer(
            p, groups,
            embed_w=params["embed_w"] if li == 0 else None,
            embed_b=params["embed_b"] if li == 0 else None)
        x = pght_conv(x, attn_bias, lw, groups=groups, tile_n=tile_n)
        # TODO(synk): PGHTConv also receives data.pos; its exact use is not defined
        # in the provided reference, so positions are not consumed here.

    # Scatter ligand node embeddings into the padded [batch, max_length, emb] tensor.
    lig_x = x[:n_lig]                       # ligand nodes are the first n_lig rows
    b_idx, pos_idx = graph_batch_indices_to_sequence(lig_batch, batch_size)
    return scatter_to_sequence(lig_x, b_idx, pos_idx, batch_size, max_length)


# --------------------------------------------------------------------------
# Main
# --------------------------------------------------------------------------
if __name__ == "__main__":
    key = jax.random.PRNGKey(0)

    # Synthetic hetero-graph flattened to a homogeneous graph (ligand nodes first).
    N_LIG, N_REC, N_ATM = 24, 80, 36
    N = N_LIG + N_REC + N_ATM            # 140 nodes -> padded to 256 (2 x 128-row tiles)
    F_RAW = 8                            # raw node-feature dim fed to graph_embedder
    IN_C, HID_C, OUT_C = 16, [32], 32
    EDGE_C = 4
    GROUPS = 4
    MAX_LEN = 32
    BATCH = 2
    E = 320
    TILE_N = 128                         # even 2-step dst grid for this graph size

    keys = jax.random.split(key, 8)
    x_raw = jax.random.normal(keys[0], (N, F_RAW), jnp.float32)
    src = jax.random.randint(keys[1], (E,), 0, N)
    dst = jax.random.randint(keys[2], (E,), 0, N)
    edge_index = jnp.stack([src, dst]).astype(jnp.int32)
    edge_attr = jax.random.normal(keys[3], (E, EDGE_C), jnp.float32)
    lig_batch = jnp.array([0] * 14 + [1] * 10, jnp.int32)   # per-ligand-node batch id

    def init(k, shape, fan_in):
        return jax.random.normal(k, shape, jnp.float32) / jnp.sqrt(float(fan_in))

    pkeys = jax.random.split(keys[4], 8)
    num_channels = [IN_C, *HID_C, OUT_C]
    conv_params = []
    for li, (ci, co) in enumerate(zip(num_channels[:-1], num_channels[1:])):
        kk = jax.random.split(pkeys[2 + li], 5)
        conv_params.append(dict(
            wq=init(kk[0], (ci, co), ci),
            wk=init(kk[1], (ci, co), ci),
            wv=init(kk[2], (ci, co), ci),
            wo=init(kk[3], (co, co), co),
            ws=init(kk[4], (ci, co), ci),
            bo=jnp.zeros((1, co), jnp.float32),
        ))

    params = dict(
        embed_w=init(pkeys[0], (F_RAW, IN_C), F_RAW),
        embed_b=jnp.zeros((1, IN_C), jnp.float32),
        w_edge=init(pkeys[1], (EDGE_C, 1), EDGE_C),
        convs=conv_params,
    )

    res = graph_encoder_forward(
        x_raw, edge_index, edge_attr, lig_batch, params,
        n_lig=N_LIG, groups=GROUPS, max_length=MAX_LEN, batch_size=BATCH,
        tile_n=TILE_N,
    )
    jax.block_until_ready(res)
    assert res.shape == (BATCH, MAX_LEN, OUT_C)
    print("KERNEL_OK")
</pallas_src>

<mosaic_0001>
module attributes {stable_mosaic.version = 11 : i64} {
  func.func @_proj_kernel(%arg0: i32, %arg1: memref<128x8xf32, #tpu.memory_space<vmem>>, %arg2: memref<8x128xbf16, #tpu.memory_space<vmem>>, %arg3: memref<1x128xf32, #tpu.memory_space<vmem>>, %arg4: memref<128x128xbf16, #tpu.memory_space<vmem>>) attributes {dimension_semantics = [#tpu.dimension_semantics<parallel>], iteration_bounds = array<i64: 2>, scalar_prefetch = 0 : i64, scratch_operands = 0 : i64, tpu.core_type = #tpu.core_type<tc>, window_params = [{transform_indices = @transform_0, window_bounds = array<i64: 128, 8>}, {pipeline_mode = #tpu.pipeline_mode<synchronous>, transform_indices = @transform_1, window_bounds = array<i64: 8, 128>}, {pipeline_mode = #tpu.pipeline_mode<synchronous>, transform_indices = @transform_2, window_bounds = array<i64: 1, 128>}, {transform_indices = @transform_3, window_bounds = array<i64: 128, 128>}]} {
    %c0 = arith.constant 0 : index
    %c0_0 = arith.constant 0 : index
    %0 = vector.load %arg1[%c0, %c0_0] : memref<128x8xf32, #tpu.memory_space<vmem>>, vector<128x8xf32>
    %1 = arith.truncf %0 : vector<128x8xf32> to vector<128x8xbf16>
    %c0_1 = arith.constant 0 : index
    %c0_2 = arith.constant 0 : index
    %2 = vector.load %arg2[%c0_1, %c0_2] : memref<8x128xbf16, #tpu.memory_space<vmem>>, vector<8x128xbf16>
    %cst = arith.constant dense<0.000000e+00> : vector<128x128xf32>
    %3 = tpu.matmul %1, %2, %cst {dimension_numbers = #tpu.dot_dimension_numbers<[1], [0], [0], [1], [0, 0, 1, 1], [], []>} : vector<128x8xbf16>, vector<8x128xbf16>, vector<128x128xf32> -> vector<128x128xf32>
    %c0_3 = arith.constant 0 : index
    %c0_4 = arith.constant 0 : index
    %4 = vector.load %arg3[%c0_3, %c0_4] : memref<1x128xf32, #tpu.memory_space<vmem>>, vector<1x128xf32>
    %5 = vector.broadcast %4 : vector<1x128xf32> to vector<128x128xf32>
    %6 = arith.addf %3, %5 : vector<128x128xf32>
    %7 = arith.truncf %6 : vector<128x128xf32> to vector<128x128xbf16>
    %c0_5 = arith.constant 0 : index
    %c0_6 = arith.constant 0 : index
    %8 = vector.load %arg4[%c0_5, %c0_6] : memref<128x128xbf16, #tpu.memory_space<vmem>>, vector<128x128xbf16>
    tpu.vector_store %arg4[%c0_5, %c0_6], %7 {strides = array<i32>} : memref<128x128xbf16, #tpu.memory_space<vmem>>, vector<128x128xbf16>,
    return
  }
  func.func @transform_0(%arg0: i32) -> (i32, i32) {
    %c0_i32 = arith.constant 0 : i32
    %c0_i32_0 = arith.constant 0 : i32
    return %arg0, %c0_i32 : i32, i32
  }
  func.func @transform_1(%arg0: i32) -> (i32, i32) {
    %c0_i32 = arith.constant 0 : i32
    %c0_i32_0 = arith.constant 0 : i32
    %c0_i32_1 = arith.constant 0 : i32
    return %c0_i32, %c0_i32_0 : i32, i32
  }
  func.func @transform_2(%arg0: i32) -> (i32, i32) {
    %c0_i32 = arith.constant 0 : i32
    %c0_i32_0 = arith.constant 0 : i32
    %c0_i32_1 = arith.constant 0 : i32
    return %c0_i32, %c0_i32_0 : i32, i32
  }
  func.func @transform_3(%arg0: i32) -> (i32, i32) {
    %c0_i32 = arith.constant 0 : i32
    %c0_i32_0 = arith.constant 0 : i32
    return %arg0, %c0_i32 : i32, i32
  }
}

</mosaic_0001>

<bundles_post_ra>
// kernel: tpu_custom_call.1
= control target key start
LH: loop header
LB: loop body
LE: loop exit
PB: predicated region body
PF: predicated region fallthrough
CT: control target
= control target key end

     0   :  { %8 = vsyncpa [#allocation3], 0  ;;  %s875_s0 = inlined_call_operand.vmem [shape: f32[256,8], index: 0, kind: input, shape index: {}]   ;;  %s876_s1 = inlined_call_operand.vmem [shape: bf16[8,128], index: 1, kind: input, shape index: {}]   ;;  %s877_s2 = inlined_call_operand.vmem [shape: f32[1,128], index: 2, kind: input, shape index: {}]   ;;  %s878_s3 = inlined_call_operand.hbm [shape: bf16[256,128], index: 3, kind: output, shape index: {}]  }
   0x1   :  { %10 = vsyncpa [#allocation3 + $0x1], 0  ;;  %s745_s12 = smov 0   ;;  %s747_s13 = smov 0  }
   0x2   :  { %s749_s14 = smov 0   ;;  %s751_s15 = smov 0  }
   0x3 LB: > { %s766_s16 = sadd.s32 4294967295, %s720_s15   ;;  %s487_s17 = sadd.s32 4294967294, %s720_s15   ;;  %s720_s15 = sphi %s751_s15, %s884_s15   ;;  %s716_s14 = sphi %s749_s14, %s883_s14   ;;  %s712_s13 = sphi %s747_s13, %s882_s13   ;;  %s708_s12 = sphi %s745_s12, %s881_s12  }
   0x4   : > { %s770_s18 = sadd.s32 1, %s720_s15   ;;  %s91_s19 = sadd.s32 1, %s716_s14 }
   0x5   : > { %s88_s20 = ssub.s32 %s720_s15, %s770_s18  ;;  %p101_p0 = scmp.ne.s32.totalorder %s716_s14, %s712_s13 }
   0x6   : > { %p89_p1 = scmp.eq.s32.totalorder %s88_s20, 0  ;;  %p102_p2 = scmp.eq.s32.totalorder %s766_s16, 1 }
   0x7   : > { %p107_p3 = scmp.ne.s32.totalorder %s712_s13, %s708_s12  ;;  %p108_p4 = scmp.eq.s32.totalorder %s487_s17, 1 }
   0x8   : > { %s781_s21 = scalar_select %p89_p1, %s716_s14, %s91_s19  }
   0x9   : > { %p783_p5 = por %p102_p2, %p101_p0  ;;  %p787_p6 = por %p108_p4, %p107_p3 }
   0xa   : > { %p490_p7 = scmp.ge.s32.totalorder %s720_s15, 1  ;;  %p141_p8 = scmp.lt.s32.totalorder %s720_s15, 3 }
   0xc   : > { %p142_p9 = pnand %p490_p7, %p141_p8 }
   0xd   : > { %s492_s26 = sshll.u32 (!%p142_p9), %s766_s16, 4  ;;  %s162_s4 = sand.u32 (!%p142_p9), 1, %s712_s13  }
   0xe   : > { %145 = sbr.rel (%p142_p9) target bundleno = 252 (0xfc), region = 32  ;;  %p166_p10 = scmp.lt.s32.totalorder (!%p142_p9), %s492_s26, 31 }
   0xf   : > { %s491_s7 = sshll.u32 (!%p142_p9), %s162_s4, 6  ;;  %s540_s9 = sshll.u32 (!%p142_p9), %s766_s16, 10 }
  0x10   : > { %s814_s8 = scalar_lea.vmem (!%p142_p9), [#allocation2], %s491_s7  ;;  %s826_s19 = scalar_lea.hbm (!%p142_p9), %s878_s3, %s540_s9 }
  0x11   : > { %s425_s10 = sshll.u32 (!%p142_p9), %s814_s8, 4  ;;  %s835_s16 = scalar_lea.sflag (!%p142_p9), [#allocation3], %s162_s4  ;;  %s828_s10 = int_to_ptr.vmem [resolvable:$true] %s425_s10 }
  0x12   : > { %s660_s20 = scalar_lea.vmem (!%p142_p9), %s828_s10, 1024  ;;  %s722_s24 = smov (!%p142_p9), [#allocation2]  }
  0x13   : > { %v197_v0 = vld [vmem:[%s876_s1] sm:$0xf]  ;;  %vm230_vm0 = vcmask 1043456   ;;  %s886_s26 = smov (!%p166_p10, %s492_s26), 31  ;;  %vm205_vm1 = vcmask 64512   ;;  %p661_p11 = scmp.ne.s32.totalorder %s828_s10, %s660_s20 }
  0x14   : > { %617 = vmatprep.subr.msk.bf16.mxu0 %vm230_vm0, %v197_v0  ;;  %618 = vmatprep.subr.msk.bf16.mxu1 %vm230_vm0, %v197_v0  ;;  %v232_v1 = vsel %vm230_vm0, %v197_v0, 0  ;;  %s493_s27 = sshll.u32 %s886_s26, 3  ;;  %v494_v28 = vld [vmem:[%s877_s2] ss:$0 sm:$0xff]  ;;  %s664_s25 = sshll.u32 %s722_s24, 4  ;;  %s665_s25 = int_to_ptr.vmem [resolvable:$false] %s664_s25 }
  0x15   : > { %598 = vmatpush3.bf16.msra.mxu0 %v232_v1  ;;  %616 = vmatpush3.bf16.msra.mxu1 %v232_v1  ;;  %s169_s30 = scalar_lea.vmem %s875_s0, %s493_s27  ;;  %p662_p12 = pnand %p661_p11, %p783_p5 }
  0x16   : > { %v173_v2 = vld [vmem:[%s169_s30] sm:$0xff]  ;;  %v174_v3 = vld [vmem:[%s169_s30 + $0x8] sm:$0xff]  ;;  %v175_v7 = vld [vmem:[%s169_s30 + $0x10] sm:$0xff]  ;;  %s666_s26 = scalar_lea.vmem %s665_s25, 2048  ;;  %p667_p0 = scmp.lt.s32.totalorder %s828_s10, %s665_s25 }
  0x17   : > { %v181_v4 = vld [vmem:[%s169_s30 + $0x40] sm:$0xff]  ;;  %v189_v5 = vpack.c.bf16 %v174_v3, %v173_v2  ;;  %v182_v6 = vld [vmem:[%s169_s30 + $0x48] sm:$0xff]  ;;  %v176_v8 = vld [vmem:[%s169_s30 + $0x18] sm:$0xff]  ;;  %p663_p13 = pneg %p662_p12  ;;  %p668_p1 = scmp.lt.s32.totalorder %s666_s26, %s660_s20 }
  0x18   : > { %v193_v9 = vpack.c.bf16 %v182_v6, %v181_v4  ;;  %v190_v10 = vpack.c.bf16 %v176_v8, %v175_v7  ;;  %v183_v11 = vld [vmem:[%s169_s30 + $0x50] sm:$0xff]  ;;  %v184_v12 = vld [vmem:[%s169_s30 + $0x58] sm:$0xff]  ;;  %v177_v13 = vld [vmem:[%s169_s30 + $0x20] sm:$0xff] }
  0x19   : > { %599 = vmatprep.mubr.msk.bf16.mxu0 %vm205_vm1, %v189_v5  ;;  %v194_v14 = vpack.c.bf16 %v184_v12, %v183_v11  ;;  %v178_v15 = vld [vmem:[%s169_s30 + $0x28] sm:$0xff]  ;;  %v185_v16 = vld [vmem:[%s169_s30 + $0x60] sm:$0xff]  ;;  %v179_v20 = vld [vmem:[%s169_s30 + $0x30] sm:$0xff]  ;;  %p669_p2 = por %p668_p1, %p667_p0 }
  0x1a   : > { %v186_v17 = vld [vmem:[%s169_s30 + $0x68] sm:$0xff]  ;;  %607 = vmatprep.mubr.msk.bf16.mxu1 %vm205_vm1, %v193_v9  ;;  %600 = vmatmul.mubr.msk.bf16.vlgmr.msra.gmra.mxu0 %vm205_vm1, %v190_v10  ;;  %v191_v18 = vpack.c.bf16 %v178_v15, %v177_v13  ;;  %v180_v21 = vld [vmem:[%s169_s30 + $0x38] sm:$0xff]  ;;  %v187_v22 = vld [vmem:[%s169_s30 + $0x70] sm:$0xff] }
  0x1b   : > { %v195_v19 = vpack.c.bf16 %v186_v17, %v185_v16  ;;  %608 = vmatmul.mubr.msk.bf16.vlgmr.msra.gmra.mxu1 %vm205_vm1, %v194_v14  ;;  %v188_v23 = vld [vmem:[%s169_s30 + $0x78] sm:$0xff]  ;;  %v192_v24 = vpack.c.bf16 %v180_v21, %v179_v20  ;;  %p670_p3 = pnand %p669_p2, %p663_p13 }
  0x1c   : > { %603 = vmatprep.mubr.msk.bf16.mxu0 %vm205_vm1, %v191_v18  ;;  %v196_v25 = vpack.c.bf16 %v188_v23, %v187_v22 }
  0x1d   : > { %611 = vmatprep.mubr.msk.bf16.mxu1 %vm205_vm1, %v195_v19 }
  0x22   : > { %604 = vmatmul.mubr.msk.bf16.gmra.mxu0 %vm205_vm1, %v192_v24 }
  0x23   : > { %612 = vmatmul.mubr.msk.bf16.gmra.mxu1 %vm205_vm1, %v196_v25 }
  0xda   : > { %v601_v26 = vpop.f32.mrf.mxu0 }
  0xdb   : > { %v609_v27 = vpop.f32.mrf.mxu1  ;;  %v277_v32 = vadd.f32 %v601_v26, %v494_v28 }
  0xdc   : > { %v268_v29 = vpop.f32.mrf.mxu0  ;;  %v309_v35 = vadd.f32 %v609_v27, %v494_v28 }
  0xdd   : > { %v300_v30 = vpop.f32.mrf.mxu1  ;;  %v269_v38 = vadd.f32 %v494_v28, %v268_v29 }
  0xde   : > { %v602_v31 = vpop.f32.mrf.mxu0  ;;  %v301_v42 = vadd.f32 %v494_v28, %v300_v30 }
  0xdf   : > { %v280_v33 = vadd.f32 %v602_v31, %v494_v28  ;;  %v610_v34 = vpop.f32.mrf.mxu1 }
  0xe0   : > { %v312_v36 = vadd.f32 %v610_v34, %v494_v28  ;;  %v271_v37 = vpop.f32.mrf.mxu0 }
  0xe1   : > { %v549_v39 = vpack.c.bf16 %v280_v33, %v277_v32  ;;  %v272_v40 = vadd.f32 %v494_v28, %v271_v37  ;;  %v303_v41 = vpop.f32.mrf.mxu1 }
  0xe2   : > { %v569_v43 = vpack.c.bf16 %v312_v36, %v309_v35  ;;  %v304_v44 = vadd.f32 %v494_v28, %v303_v41  ;;  %v605_v45 = vpop.f32.mrf.mxu0 }
  0xe3   : > { %581 = vst [vmem:[%s814_s8 + $0x8] sm:$0xff] %v549_v39   ;;  %v544_v46 = vpack.c.bf16 %v272_v40, %v269_v38  ;;  %v613_v47 = vpop.f32.mrf.mxu1  ;;  %v293_v52 = vadd.f32 %v605_v45, %v494_v28 }
  0xe4   : > { %585 = vst [vmem:[%s814_s8 + $0x28] sm:$0xff] %v569_v43   ;;  %v564_v48 = vpack.c.bf16 %v304_v44, %v301_v42  ;;  %v284_v49 = vpop.f32.mrf.mxu0  ;;  %v325_v55 = vadd.f32 %v613_v47, %v494_v28 }
  0xe5   : > { %545 = vst [vmem:[%s814_s8] sm:$0xff] %v544_v46   ;;  %v316_v50 = vpop.f32.mrf.mxu1  ;;  %v285_v58 = vadd.f32 %v494_v28, %v284_v49 }
  0xe6   : > { %584 = vst [vmem:[%s814_s8 + $0x20] sm:$0xff] %v564_v48   ;;  %v606_v51 = vpop.f32.mrf.mxu0  ;;  %v317_v62 = vadd.f32 %v494_v28, %v316_v50 }
  0xe7   : > { %v296_v53 = vadd.f32 %v606_v51, %v494_v28  ;;  %v614_v54 = vpop.f32.mrf.mxu1 }
  0xe8   : > { %v328_v56 = vadd.f32 %v614_v54, %v494_v28  ;;  %v287_v57 = vpop.f32.mrf.mxu0 }
  0xe9   : > { %v559_v59 = vpack.c.bf16 %v296_v53, %v293_v52  ;;  %v288_v60 = vadd.f32 %v494_v28, %v287_v57  ;;  %v319_v61 = vpop.f32.mrf.mxu1 }
  0xea   : > { %v579_v63 = vpack.c.bf16 %v328_v56, %v325_v55  ;;  %v320_v0 = vadd.f32 %v494_v28, %v319_v61 }
  0xeb   : > { %583 = vst [vmem:[%s814_s8 + $0x18] sm:$0xff] %v559_v59   ;;  %v554_v1 = vpack.c.bf16 %v288_v60, %v285_v58 }
  0xec   : > { %587 = vst [vmem:[%s814_s8 + $0x38] sm:$0xff] %v579_v63   ;;  %v574_v2 = vpack.c.bf16 %v320_v0, %v317_v62 }
  0xed   : > { %582 = vst [vmem:[%s814_s8 + $0x10] sm:$0xff] %v554_v1  }
  0xee   : > { %586 = vst [vmem:[%s814_s8 + $0x30] sm:$0xff] %v574_v2  }
  0xef   : > { %673 = shalt.err (!%p670_p3)
}
  0xf0   : > { %s674_s27 = scalar_lea.hbm %s826_s19, 1024  ;;  %s678_s30 = scalar_lea.hbm %s878_s3, 2048 }
  0xf1   : > { %p675_p4 = scmp.ne.s32.totalorder %s826_s19, %s674_s27  ;;  %p679_p9 = scmp.lt.s32.totalorder %s826_s19, %s878_s3 }
  0xf2   : > { %p680_p10 = scmp.lt.s32.totalorder %s678_s30, %s674_s27 }
  0xf3   : > { %p676_p7 = pnand %p675_p4, %p783_p5 }
  0xf4   : > { %p681_p11 = por %p680_p10, %p679_p9 }
  0xf5   : > { %p677_p8 = pneg %p676_p7 }
  0xf7   : > { %p682_p12 = pnand %p681_p11, %p677_p8 }
  0xf9   : > { %685 = shalt.err (!%p682_p12)
}
  0xfa   : > { %s723_s6 = smov 64   ;;  %s724_s7 = smov 4  }
  0xfb   : > { %619 = dma.vmem_to_hbm [thread:$0]  (%p783_p5), %s828_s10, 1024, %s826_s19, %s835_s16, %s723_s6, %s723_s6, %s724_s7  }
  0xfc PF: > { %p625_p13 = scmp.ge.s32.totalorder %s720_s15, 2  ;;  %s440_s8 = sand.u32 1, %s708_s12  }
  0xfd   : > { %s441_s9 = scalar_lea.sflag [#allocation3], %s440_s8 }
  0xfe   : > { %p622_p0 = pnand %p625_p13, %p787_p6 }
 0x100   : > { %p623_p1 = pneg %p622_p0 }
 0x102   : > { %703 = dma.done.wait (%p623_p1), %s441_s9, 1024  }
 0x103   : > { %705 = vsyncadd (%p623_p1), %s441_s9, 4294966272  ;;  %p13_p2 = scmp.ge.s32.totalorder %s770_s18, 4   ;;  %s881_s12 = smov %s712_s13 }
 0x104   : > { %s882_s13 = smov %s716_s14  ;;  %s883_s14 = smov %s781_s21 }
 0x105   : > { %s884_s15 = smov %s770_s18  ;;  %15 = sbr.rel (!%p13_p2) target bundleno = 3 (0x3), region = 67 }
 0x10a   :  { %446 = vsyncpa [#allocation3], 1 }
 0x10b   :  { %448 = vsyncpa [#allocation3 + $0x1], 1 }

</bundles_post_ra>
